<compile_context>
chip_gen: v6e
topology: v6e:2x2x1
jax: 0.10.0
libtpu: 0.0.40
codegen_flags: <defaults>
</compile_context>

<pallas_src>
import jax
import jax.numpy as jnp
from jax.experimental import pallas as pl
from jax.experimental.pallas import tpu as pltpu


def _mlp_kernel(x_ref, w1t_ref, b1_ref, w2t_ref, b2_ref, o_ref):
    # x: [TB, D] bf16, w1t: [D, Hp] bf16, b1: [1, Hp] f32, w2t: [Hp, Op] bf16, b2: [1, Op] f32
    # linear1 (f32 accumulate) + bias + relu, all elementwise work in f32
    h = jnp.dot(x_ref[...], w1t_ref[...], preferred_element_type=jnp.float32) + b1_ref[...]
    h = jnp.maximum(h, 0.0)
    # linear2: cast relu output to bf16 only for the MXU operands, accumulate f32
    o = jnp.dot(h.astype(jnp.bfloat16), w2t_ref[...],
                preferred_element_type=jnp.float32) + b2_ref[...]
    o_ref[...] = o.astype(o_ref.dtype)


def _round_up(x, m):
    return ((x + m - 1) // m) * m


def mnist_module_forward(xb, w1, b1, w2, b2):
    """xb: [B, C, H, W] float32. w1: [hidden, inSize], w2: [out, hidden] (PyTorch Linear).
    Returns logits [B, out] float32."""
    B = xb.shape[0]
    x2d = xb.reshape(B, -1)                       # .view(B, -1) equivalent (row-major)
    D = x2d.shape[1]
    H = w1.shape[0]
    O = w2.shape[0]

    LANE = 128
    Hp = _round_up(H, LANE)                       # pad hidden dim to lane width
    Op = _round_up(O, LANE)                       # pad output dim to lane width

    # Pre-transpose + zero-pad weights/biases once in the wrapper; bf16 for MXU operands.
    w1t = jnp.zeros((D, Hp), jnp.float32).at[:, :H].set(w1.T).astype(jnp.bfloat16)
    b1p = jnp.zeros((1, Hp), jnp.float32).at[:, :H].set(b1)
    w2t = jnp.zeros((Hp, Op), jnp.float32).at[:H, :O].set(w2.T).astype(jnp.bfloat16)
    b2p = jnp.zeros((1, Op), jnp.float32).at[:, :O].set(b2)

    # Batch tiling: TB up to 256, batch zero-padded to a multiple of TB.
    TB = min(256, _round_up(B, 8))
    Bp = _round_up(B, TB)
    xp = jnp.zeros((Bp, D), jnp.float32).at[:B].set(x2d).astype(jnp.bfloat16)

    grid = (Bp // TB,)
    out = pl.pallas_call(
        _mlp_kernel,
        out_shape=jax.ShapeDtypeStruct((Bp, Op), jnp.float32),
        grid_spec=pl.GridSpec(
            grid=grid,
            in_specs=[
                pl.BlockSpec((TB, D), lambda i: (i, 0)),   # activations: tiled over batch
                pl.BlockSpec((D, Hp), lambda i: (0, 0)),   # weights/biases: resident
                pl.BlockSpec((1, Hp), lambda i: (0, 0)),
                pl.BlockSpec((Hp, Op), lambda i: (0, 0)),
                pl.BlockSpec((1, Op), lambda i: (0, 0)),
            ],
            out_specs=pl.BlockSpec((TB, Op), lambda i: (i, 0)),
        ),
        compiler_params=pltpu.CompilerParams(
            dimension_semantics=("parallel",),             # megacore-shard the batch axis
        ),
    )(xp, w1t, b1p, w2t, b2p)

    # Strip batch padding and lane padding.
    return out[:B, :O]


if __name__ == "__main__":
    # Small MNIST-like shapes: B=8, single channel 16x16 image -> inSize=256.
    B, C, Himg, Wimg = 8, 1, 16, 16
    inSize = C * Himg * Wimg
    hiddenSize = 32
    num_classes = 10

    key = jax.random.PRNGKey(0)
    k_x, k_w1, k_b1, k_w2, k_b2 = jax.random.split(key, 5)

    xb = jax.random.normal(k_x, (B, C, Himg, Wimg), dtype=jnp.float32)

    # Deterministic init mimicking PyTorch nn.Linear default: U(-1/sqrt(fan_in), 1/sqrt(fan_in)).
    bound1 = 1.0 / (inSize ** 0.5)
    w1 = jax.random.uniform(k_w1, (hiddenSize, inSize), jnp.float32, -bound1, bound1)
    b1 = jax.random.uniform(k_b1, (hiddenSize,), jnp.float32, -bound1, bound1)
    bound2 = 1.0 / (hiddenSize ** 0.5)
    w2 = jax.random.uniform(k_w2, (num_classes, hiddenSize), jnp.float32, -bound2, bound2)
    b2 = jax.random.uniform(k_b2, (num_classes,), jnp.float32, -bound2, bound2)

    logits = mnist_module_forward(xb, w1, b1, w2, b2)
    jax.block_until_ready(logits)
    assert logits.shape == (B, num_classes)

    # Reference 1: same bf16-MXU-input / f32-accumulate recipe (tight tolerance).
    x2d = xb.reshape(B, -1)
    h_ref = jnp.dot(x2d.astype(jnp.bfloat16), w1.T.astype(jnp.bfloat16),
                    preferred_element_type=jnp.float32) + b1
    h_ref = jnp.maximum(h_ref, 0.0)
    ref_bf16 = jnp.dot(h_ref.astype(jnp.bfloat16), w2.T.astype(jnp.bfloat16),
                       preferred_element_type=jnp.float32) + b2
    assert jnp.allclose(logits, ref_bf16, atol=1e-2, rtol=1e-2)

    # Reference 2: pure f32 math (loose tolerance, bf16 MXU inputs lose ~8 mantissa bits).
    ref_f32 = jnp.maximum(x2d @ w1.T + b1, 0.0) @ w2.T + b2
    assert jnp.allclose(logits, ref_f32, atol=3e-2, rtol=3e-2)

    print("KERNEL_OK")
</pallas_src>

<mosaic_0001>
module attributes {stable_mosaic.version = 11 : i64} {
  func.func @_mlp_kernel(%arg0: i32, %arg1: memref<8x256xbf16, #tpu.memory_space<vmem>>, %arg2: memref<256x128xbf16, #tpu.memory_space<vmem>>, %arg3: memref<1x128xf32, #tpu.memory_space<vmem>>, %arg4: memref<128x128xbf16, #tpu.memory_space<vmem>>, %arg5: memref<1x128xf32, #tpu.memory_space<vmem>>, %arg6: memref<8x128xf32, #tpu.memory_space<vmem>>) attributes {dimension_semantics = [#tpu.dimension_semantics<parallel>], iteration_bounds = array<i64: 1>, scalar_prefetch = 0 : i64, scratch_operands = 0 : i64, tpu.core_type = #tpu.core_type<tc>, window_params = [{transform_indices = @transform_0, window_bounds = array<i64: 8, 256>}, {pipeline_mode = #tpu.pipeline_mode<synchronous>, transform_indices = @transform_1, window_bounds = array<i64: 256, 128>}, {pipeline_mode = #tpu.pipeline_mode<synchronous>, transform_indices = @transform_2, window_bounds = array<i64: 1, 128>}, {pipeline_mode = #tpu.pipeline_mode<synchronous>, transform_indices = @transform_3, window_bounds = array<i64: 128, 128>}, {pipeline_mode = #tpu.pipeline_mode<synchronous>, transform_indices = @transform_4, window_bounds = array<i64: 1, 128>}, {transform_indices = @transform_5, window_bounds = array<i64: 8, 128>}]} {
    %c0 = arith.constant 0 : index
    %c0_0 = arith.constant 0 : index
    %0 = vector.load %arg1[%c0, %c0_0] : memref<8x256xbf16, #tpu.memory_space<vmem>>, vector<8x256xbf16>
    %c0_1 = arith.constant 0 : index
    %c0_2 = arith.constant 0 : index
    %1 = vector.load %arg2[%c0_1, %c0_2] : memref<256x128xbf16, #tpu.memory_space<vmem>>, vector<256x128xbf16>
    %cst = arith.constant dense<0.000000e+00> : vector<8x128xf32>
    %2 = tpu.matmul %0, %1, %cst {dimension_numbers = #tpu.dot_dimension_numbers<[1], [0], [0], [1], [0, 0, 1, 1], [], []>} : vector<8x256xbf16>, vector<256x128xbf16>, vector<8x128xf32> -> vector<8x128xf32>
    %c0_3 = arith.constant 0 : index
    %c0_4 = arith.constant 0 : index
    %3 = vector.load %arg3[%c0_3, %c0_4] : memref<1x128xf32, #tpu.memory_space<vmem>>, vector<1x128xf32>
    %4 = vector.broadcast %3 : vector<1x128xf32> to vector<8x128xf32>
    %5 = arith.addf %2, %4 : vector<8x128xf32>
    %cst_5 = arith.constant 0.000000e+00 : f32
    %6 = vector.broadcast %cst_5 : f32 to vector<8x128xf32>
    %7 = arith.maximumf %5, %6 : vector<8x128xf32>
    %8 = arith.truncf %7 : vector<8x128xf32> to vector<8x128xbf16>
    %c0_6 = arith.constant 0 : index
    %c0_7 = arith.constant 0 : index
    %9 = vector.load %arg4[%c0_6, %c0_7] : memref<128x128xbf16, #tpu.memory_space<vmem>>, vector<128x128xbf16>
    %cst_8 = arith.constant dense<0.000000e+00> : vector<8x128xf32>
    %10 = tpu.matmul %8, %9, %cst_8 {dimension_numbers = #tpu.dot_dimension_numbers<[1], [0], [0], [1], [0, 0, 1, 1], [], []>} : vector<8x128xbf16>, vector<128x128xbf16>, vector<8x128xf32> -> vector<8x128xf32>
    %c0_9 = arith.constant 0 : index
    %c0_10 = arith.constant 0 : index
    %11 = vector.load %arg5[%c0_9, %c0_10] : memref<1x128xf32, #tpu.memory_space<vmem>>, vector<1x128xf32>
    %12 = vector.broadcast %11 : vector<1x128xf32> to vector<8x128xf32>
    %13 = arith.addf %10, %12 : vector<8x128xf32>
    %c0_11 = arith.constant 0 : index
    %c0_12 = arith.constant 0 : index
    %14 = vector.load %arg6[%c0_11, %c0_12] : memref<8x128xf32, #tpu.memory_space<vmem>>, vector<8x128xf32>
    tpu.vector_store %arg6[%c0_11, %c0_12], %13 {strides = array<i32>} : memref<8x128xf32, #tpu.memory_space<vmem>>, vector<8x128xf32>,
    return
  }
  func.func @transform_0(%arg0: i32) -> (i32, i32) {
    %c0_i32 = arith.constant 0 : i32
    %c0_i32_0 = arith.constant 0 : i32
    return %arg0, %c0_i32 : i32, i32
  }
  func.func @transform_1(%arg0: i32) -> (i32, i32) {
    %c0_i32 = arith.constant 0 : i32
    %c0_i32_0 = arith.constant 0 : i32
    %c0_i32_1 = arith.constant 0 : i32
    return %c0_i32, %c0_i32_0 : i32, i32
  }
  func.func @transform_2(%arg0: i32) -> (i32, i32) {
    %c0_i32 = arith.constant 0 : i32
    %c0_i32_0 = arith.constant 0 : i32
    %c0_i32_1 = arith.constant 0 : i32
    return %c0_i32, %c0_i32_0 : i32, i32
  }
  func.func @transform_3(%arg0: i32) -> (i32, i32) {
    %c0_i32 = arith.constant 0 : i32
    %c0_i32_0 = arith.constant 0 : i32
    %c0_i32_1 = arith.constant 0 : i32
    return %c0_i32, %c0_i32_0 : i32, i32
  }
  func.func @transform_4(%arg0: i32) -> (i32, i32) {
    %c0_i32 = arith.constant 0 : i32
    %c0_i32_0 = arith.constant 0 : i32
    %c0_i32_1 = arith.constant 0 : i32
    return %c0_i32, %c0_i32_0 : i32, i32
  }
  func.func @transform_5(%arg0: i32) -> (i32, i32) {
    %c0_i32 = arith.constant 0 : i32
    %c0_i32_0 = arith.constant 0 : i32
    return %arg0, %c0_i32 : i32, i32
  }
}

</mosaic_0001>

<bundles_post_ra>
// kernel: tpu_custom_call.1
= control target key start
LH: loop header
LB: loop body
LE: loop exit
PB: predicated region body
PF: predicated region fallthrough
CT: control target
= control target key end

     0   :  { %10 = vsyncpa [#allocation3], 0  ;;  %s638_s0 = inlined_call_operand.hbm [shape: bf16[8,256], index: 0, kind: input, shape index: {}]   ;;  %s639_s1 = inlined_call_operand.hbm [shape: bf16[256,128], index: 1, kind: input, shape index: {}]   ;;  %s640_s2 = inlined_call_operand.vmem [shape: f32[1,128], index: 2, kind: input, shape index: {}]   ;;  %s641_s3 = inlined_call_operand.hbm [shape: bf16[128,128], index: 3, kind: input, shape index: {}]   ;;  %s642_s4 = inlined_call_operand.vmem [shape: f32[1,128], index: 4, kind: input, shape index: {}]   ;;  %s643_s5 = inlined_call_operand.hbm [shape: f32[8,128], index: 5, kind: output, shape index: {}]  }
   0x1   :  { %11 = vsyncpa [#allocation6], 0 }
   0x2   :  { %12 = vsyncpa [#allocation4], 0  ;;  %s573_s18 = smov [#allocation5]  }
   0x3   :  { %s28_s19 = sshll.u32 %s573_s18, 4  ;;  %s29_s19 = int_to_ptr.vmem [resolvable:$true] %s28_s19 }
   0x4   :  { %s495_s20 = scalar_lea.vmem %s29_s19, 2048  ;;  %p500_p1 = scmp.lt.s32.totalorder %s29_s19, %s29_s19 }
   0x5   :  { %p496_p0 = scmp.ne.s32.totalorder %s29_s19, %s495_s20  ;;  %p501_p2 = scmp.lt.s32.totalorder %s495_s20, %s495_s20 }
   0x7   :  { %p502_p3 = por %p501_p2, %p500_p1 }
   0x9   :  { %p503_p4 = pnand %p502_p3, %p496_p0 }
   0xb   :  { %506 = shalt.err (!%p503_p4)
}
   0xc   :  { %s574_s21 = smov 64   ;;  %s575_s22 = smov 4  }
   0xd   :  { %34 = dma.hbm_to_vmem [thread:$0]  %s639_s1, 2048, %s29_s19, [#allocation6], %s574_s21, %s574_s21, %s575_s22  }
   0xe   :  { %s576_s25 = smov [#allocation2]   ;;  %s577_s27 = smov [#allocation7]  }
   0xf   :  { %s19_s26 = sshll.u32 %s576_s25, 4  ;;  %s42_s28 = sshll.u32 %s577_s27, 4  ;;  %s20_s26 = int_to_ptr.vmem [resolvable:$true] %s19_s26  ;;  %s43_s28 = int_to_ptr.vmem [resolvable:$true] %s42_s28 }
  0x10   :  { %s515_s29 = scalar_lea.vmem %s20_s26, 128  ;;  %p520_p6 = scmp.lt.s32.totalorder %s20_s26, %s20_s26 }
  0x11   :  { %p516_p5 = scmp.ne.s32.totalorder %s20_s26, %s515_s29  ;;  %p521_p7 = scmp.lt.s32.totalorder %s515_s29, %s515_s29 }
  0x13   :  { %p522_p8 = por %p521_p7, %p520_p6 }
  0x15   :  { %p523_p9 = pnand %p522_p8, %p516_p5 }
  0x17   :  { %526 = shalt.err (!%p523_p9)
}
  0x18   :  { %22 = dma.hbm_to_vmem [thread:$0]  %s638_s0, 128, %s20_s26, [#allocation3]  }
  0x19   :  { %s535_s7 = scalar_lea.vmem %s43_s28, 1024  ;;  %p540_p11 = scmp.lt.s32.totalorder %s43_s28, %s43_s28 }
  0x1a   :  { %p536_p10 = scmp.ne.s32.totalorder %s43_s28, %s535_s7  ;;  %p541_p12 = scmp.lt.s32.totalorder %s535_s7, %s535_s7 }
  0x1c   :  { %p542_p13 = por %p541_p12, %p540_p11 }
  0x1e   :  { %p543_p0 = pnand %p542_p13, %p536_p10 }
  0x20   :  { %546 = shalt.err (!%p543_p0)
}
  0x21   :  { %48 = dma.hbm_to_vmem [thread:$0]  %s641_s3, 1024, %s43_s28, [#allocation6], %s574_s21, %s574_s21, %s575_s22  }
  0x22   :  { %567 = dma.done.wait [#allocation3], 128  }
  0x23   :  { %568 = vsyncadd [#allocation3], 4294967168 }
  0x24   :  { %569 = dma.done.wait [#allocation6], 3072  }
  0x25   :  { %570 = vsyncadd [#allocation6], 4294964224  ;;  %v578_v0 = vmov 0.0   ;;  %v461_v1 = vld [vmem:[#allocation5 + $0x78] sm:$0xff]   ;;  %v463_v3 = vld [vmem:[#allocation5 + $0x70] sm:$0xff]   ;;  %vm579_vm0 = vmmov 0  }
  0x26   :  { %433 = vmatprep.subr.bf16.mxu1 %v578_v0  ;;  %v462_v2 = vld [vmem:[#allocation5 + $0x38] sm:$0xff]   ;;  %402 = vmatprep.subr.bf16.mxu0 %v461_v1  ;;  %v464_v4 = vld [vmem:[#allocation5 + $0x30] sm:$0xff]   ;;  %v465_v5 = vld [vmem:[#allocation5 + $0x68] sm:$0xff]   ;;  %s580_s11 = smov [#allocation8]  }
  0x27   :  { %403 = vmatpush3.bf16.msra.mxu0 %v462_v2  ;;  %v466_v6 = vld [vmem:[#allocation5 + $0x28] sm:$0xff]   ;;  %v467_v7 = vld [vmem:[#allocation5 + $0x60] sm:$0xff]   ;;  %v469_v9 = vld [vmem:[#allocation5 + $0x58] sm:$0xff]   ;;  %449 = vmatprep.mubr.msk.bf16.mxu1 %vm579_vm0, %v578_v0  ;;  %s364_s12 = sshll.u32 %s580_s11, 4  ;;  %s365_s12 = int_to_ptr.vmem [resolvable:$true] %s364_s12 }
  0x28   :  { %404 = vmatprep.subr.bf16.mxu0 %v463_v3  ;;  %v468_v8 = vld [vmem:[#allocation5 + $0x20] sm:$0xff]   ;;  %v470_v10 = vld [vmem:[#allocation5 + $0x18] sm:$0xff]   ;;  %v471_v11 = vld [vmem:[#allocation5 + $0x50] sm:$0xff]   ;;  %p552_p2 = scmp.lt.s32.totalorder %s365_s12, %s365_s12 }
  0x29   :  { %v61_v12 = vld [vmem:[#allocation2] sm:$0xff]  ;;  %v472_v15 = vld [vmem:[#allocation5 + $0x10] sm:$0xff]   ;;  %v473_v16 = vld [vmem:[#allocation5 + $0x48] sm:$0xff]  }
  0x2a   :  { %v376_v13 = vcombine.high %v61_v12, %v61_v12  ;;  %v479_v14 = vld [vmem:[#allocation7 + $0x38] sm:$0xff]   ;;  %v480_v17 = vld [vmem:[#allocation7 + $0x30] sm:$0xff]   ;;  %v474_v18 = vld [vmem:[#allocation5 + $0x8] sm:$0xff]   ;;  %v375_v23 = vcombine.low %v61_v12, %v61_v12 }
  0x2b   :  { %405 = vmatpush3.bf16.msra.mxu0 %v464_v4  ;;  %434 = vmatpush3.bf16.msra.mxu1 %v479_v14  ;;  %v475_v19 = vld [vmem:[#allocation5 + $0x40] sm:$0xff]   ;;  %v481_v20 = vld [vmem:[#allocation7 + $0x28] sm:$0xff]   ;;  %v483_v24 = vld [vmem:[#allocation7 + $0x18] sm:$0xff]  }
  0x2c   :  { %406 = vmatprep.subr.bf16.mxu0 %v465_v5  ;;  %236 = vmatprep.mubr.bf16.mxu0 %v376_v13  ;;  %v476_v21 = vld [vmem:[#allocation5] sm:$0xff]   ;;  %v484_v25 = vld [vmem:[#allocation7 + $0x10] sm:$0xff]   ;;  %v485_v26 = vld [vmem:[#allocation7 + $0x8] sm:$0xff]  }
  0x2d   :  { %435 = vmatprep.subr.bf16.mxu1 %v578_v0  ;;  %v482_v22 = vld [vmem:[#allocation7 + $0x20] sm:$0xff]   ;;  %v374_v29 = vld [vmem:[%s640_s2] ss:$0 sm:$0xff]  ;;  %s547_s2 = scalar_lea.vmem %s365_s12, 128 }
  0x2e   :  { %v486_v27 = vld [vmem:[#allocation7] sm:$0xff]   ;;  %v393_v37 = vld [vmem:[%s642_s4] ss:$0 sm:$0xff]  ;;  %p548_p1 = scmp.ne.s32.totalorder %s365_s12, %s547_s2  ;;  %p553_p3 = scmp.lt.s32.totalorder %s547_s2, %s547_s2 }
  0x2f   :  { %407 = vmatpush3.bf16.msra.mxu0 %v466_v6  ;;  %436 = vmatpush3.bf16.msra.mxu1 %v480_v17 }
  0x30   :  { %408 = vmatprep.subr.bf16.mxu0 %v467_v7  ;;  %437 = vmatprep.subr.bf16.mxu1 %v578_v0  ;;  %p554_p4 = por %p553_p3, %p552_p2 }
  0x32   :  { %p555_p5 = pnand %p554_p4, %p548_p1 }
  0x33   :  { %409 = vmatpush3.bf16.msra.mxu0 %v468_v8  ;;  %438 = vmatpush3.bf16.msra.mxu1 %v481_v20 }
  0x34   :  { %410 = vmatprep.subr.bf16.mxu0 %v469_v9  ;;  %439 = vmatprep.subr.bf16.mxu1 %v578_v0 }
  0x37   :  { %411 = vmatpush3.bf16.msra.mxu0 %v470_v10  ;;  %440 = vmatpush3.bf16.msra.mxu1 %v482_v22 }
  0x38   :  { %412 = vmatprep.subr.bf16.mxu0 %v471_v11  ;;  %441 = vmatprep.subr.bf16.mxu1 %v578_v0 }
  0x3b   :  { %413 = vmatpush3.bf16.msra.mxu0 %v472_v15  ;;  %442 = vmatpush3.bf16.msra.mxu1 %v483_v24 }
  0x3c   :  { %414 = vmatprep.subr.bf16.mxu0 %v473_v16  ;;  %443 = vmatprep.subr.bf16.mxu1 %v578_v0 }
  0x3f   :  { %415 = vmatpush3.bf16.msra.mxu0 %v474_v18  ;;  %444 = vmatpush3.bf16.msra.mxu1 %v484_v25 }
  0x40   :  { %416 = vmatprep.subr.bf16.mxu0 %v475_v19  ;;  %445 = vmatprep.subr.bf16.mxu1 %v578_v0 }
  0x43   :  { %417 = vmatpush3.bf16.msra.mxu0 %v476_v21  ;;  %446 = vmatpush3.bf16.msra.mxu1 %v485_v26 }
  0x44   :  { %447 = vmatprep.subr.bf16.mxu1 %v578_v0 }
  0x46   :  { %237 = vmatmul.mubr.bf16.vlgmr.msra.gmra.mxu0 %v375_v23 }
  0x47   :  { %448 = vmatpush3.bf16.msra.mxu1 %v486_v27 }
 0x106   :  { %v418_v28 = vpop.f32.mrf.mxu0 }
 0x108   :  { %v419_v30 = vpop.f32.mrf.mxu0 }
 0x109   :  { %v420_v31 = vadd.f32 %v419_v30, %v418_v28 }
 0x10a   :  { %v421_v32 = vpop.f32.mrf.mxu0 }
 0x10b   :  { %v239_v33 = vadd.f32 %v420_v31, %v374_v29 }
 0x10c   :  { %v422_v34 = vpop.f32.mrf.mxu0 }
 0x10d   :  { %v244_v35 = vmax.f32 %v239_v33, 0.0 }
 0x10f   :  { %v245_v36 = vpack.c.bf16 %v244_v35, %v244_v35 }
 0x111   :  { %450 = vmatmul.mubr.bf16.vlgmr.msra.gmra.mxu1 %v245_v36 }
 0x1d1   :  { %v351_v38 = vpop.f32.mrf.mxu1 }
 0x1d2   :  { %v352_v39 = vadd.f32 %v393_v37, %v351_v38 }
 0x1d3   :  { %v451_v40 = vpop.f32.mrf.mxu1 }
 0x1d4   :  { %357 = vst [vmem:[#allocation8] sm:$0xff] %v352_v39 }
 0x1d5   :  { %v354_v41 = vpop.f32.mrf.mxu1 }
 0x1d6   :  { %558 = shalt.err (!%p555_p5)
}
 0x1d7   :  { %367 = dma.vmem_to_hbm [thread:$0]  %s365_s12, 128, %s643_s5, [#allocation4]   ;;  %v452_v42 = vpop.f32.mrf.mxu1 }
 0x1d8   :  { %571 = dma.done.wait [#allocation4], 128  }
 0x1d9   :  { %572 = vsyncadd [#allocation4], 4294967168 }
 0x1da   :  { %371 = vsyncpa [#allocation3], 1 }
 0x1db   :  { %372 = vsyncpa [#allocation6], 1 }
 0x1dc   :  { %373 = vsyncpa [#allocation4], 1 }

</bundles_post_ra>
